<compile_context>
chip_gen: v6e
topology: v6e:2x2x1
jax: 0.10.0
libtpu: 0.0.40
codegen_flags: <defaults>
</compile_context>

<pallas_src>
import jax
import jax.numpy as jnp
import numpy as np
from jax.experimental import pallas as pl
from jax.experimental.pallas import tpu as pltpu


def _round_up(x, m):
    return ((x + m - 1) // m) * m


def _pick_tb(B, tb):
    """Batch tile: >=2 grid steps when B > 16 (v7x megacore), multiple of 16
    (bf16 sublane packing), preferring a tile that divides B (no batch pad)."""
    if B <= 16:
        return B                                   # single full-array tile
    cap = min(tb, _round_up((B + 1) // 2, 16))     # at least 2 grid steps
    t = cap
    while t >= max(16, cap // 2):
        if B % t == 0:
            return t                               # divides B -> no pad copy
        t -= 16
    return cap


def reduction_head_kernel(x_ref, wbd_ref, shift_ref, wlin_ref, bias_ref, out_ref):
    """One batch tile per grid step; weights VMEM-resident.

    x_ref:     (TB, Cin*S)  bf16 input slab, feature index = c*S + s (torch order)
    wbd_ref:   (Cin*S, NHP) bf16 merged 1x1-conv weight (BN2 scale folded), lane-padded
    shift_ref: (1, NHP)     f32 BN2 shift repeated per spatial position, zero-padded
    wlin_ref:  (NHP, OP)    bf16 linear weight (BN1 scale folded), lane-padded
    bias_ref:  (1, OP)      f32 linear bias with BN1 folded, lane-padded
    out_ref:   (TB, OP)     f32 output
    """
    # Conv2d 1x1 over all spatial positions + BatchNorm2d, as one bf16 MXU matmul
    # accumulating in f32.
    h = jnp.dot(x_ref[...], wbd_ref[...], preferred_element_type=jnp.float32)
    h = h + shift_ref[...]
    # LeakyReLU(0.1); Dropout in eval mode is identity.
    h = jnp.where(h >= 0.0, h, 0.1 * h)
    # Linear + BatchNorm1d (folded), as one bf16 MXU matmul with f32 accumulation.
    y = jnp.dot(h.astype(wlin_ref.dtype), wlin_ref[...],
                preferred_element_type=jnp.float32) + bias_ref[...]
    out_ref[...] = y.astype(out_ref.dtype)


def reduction_head_forward(x_nchw, params, *, tb=256):
    """x_nchw: (B, Cin, P, P) float32.  Returns (B, Out) float32."""
    B, Cin, H, W = x_nchw.shape
    S = H * W
    wbd = params["wbd"]        # (Cin*S, NHP) bf16
    shift = params["shift"]    # (1, NHP)     f32
    wlin = params["wlin"]      # (NHP, OP)    bf16
    bias = params["bias"]      # (1, OP)      f32
    out_features = params["out_features"]
    KIN, NHP = wbd.shape
    OP = wlin.shape[1]
    assert KIN == Cin * S

    # Natural contiguous flatten (feature index = c*S + s): a free view, NOT a
    # transpose.  bf16 cast halves the input DMA bytes; accumulation stays f32.
    xf = x_nchw.reshape(B, KIN).astype(jnp.bfloat16)

    TB = _pick_tb(B, tb)
    Bp = _round_up(B, TB)
    if Bp != B:
        xf = jnp.pad(xf, ((0, Bp - B), (0, 0)))
    grid = (Bp // TB,)

    # Advisory cost estimate for XLA scheduling of surrounding glue ops.
    bytes_accessed = int(
        Bp * KIN * xf.dtype.itemsize
        + wbd.size * wbd.dtype.itemsize + shift.size * shift.dtype.itemsize
        + wlin.size * wlin.dtype.itemsize + bias.size * bias.dtype.itemsize
        + Bp * OP * 4)
    cost = pl.CostEstimate(flops=int(2 * Bp * NHP * (KIN + OP)),
                           transcendentals=0,
                           bytes_accessed=bytes_accessed)

    # Explicit VMEM budget: double-buffered blocks + headroom (always << 64 MiB).
    block_bytes = (TB * KIN * xf.dtype.itemsize
                   + wbd.size * wbd.dtype.itemsize + shift.size * shift.dtype.itemsize
                   + wlin.size * wlin.dtype.itemsize + bias.size * bias.dtype.itemsize
                   + TB * OP * 4)
    vmem_limit = int(max(4 * block_bytes, 8 * 1024 * 1024))

    out = pl.pallas_call(
        reduction_head_kernel,
        out_shape=jax.ShapeDtypeStruct((Bp, OP), jnp.float32),
        grid=grid,
        in_specs=[
            pl.BlockSpec((TB, KIN), lambda i: (i, 0)),
            pl.BlockSpec((KIN, NHP), lambda i: (0, 0)),
            pl.BlockSpec((1, NHP), lambda i: (0, 0)),
            pl.BlockSpec((NHP, OP), lambda i: (0, 0)),
            pl.BlockSpec((1, OP), lambda i: (0, 0)),
        ],
        out_specs=pl.BlockSpec((TB, OP), lambda i: (i, 0)),
        compiler_params=pltpu.CompilerParams(
            dimension_semantics=("parallel",),
            vmem_limit_bytes=vmem_limit),
        cost_estimate=cost,
    )(xf, wbd, shift, wlin, bias)
    return out[:B, :out_features]


def make_params(key, in_features, hidden_feature, out_features, pooling_size):
    """Deterministic synthetic parameters (shapes follow the PyTorch module),
    with both BatchNorms folded, the torch channel-major layout baked into the
    merged conv weight (no runtime transpose), bf16 weights, and all lane dims
    padded to multiples of 128."""
    S = pooling_size * pooling_size
    ks = jax.random.split(key, 10)
    # Conv2d(in_features, hidden_feature, 1, bias=False): weight (Hid, Cin)
    conv_w = jax.random.normal(ks[0], (hidden_feature, in_features)) * 0.1
    # BatchNorm2d(hidden_feature) params + running stats (inference).
    bn2_gamma = 1.0 + 0.1 * jax.random.normal(ks[1], (hidden_feature,))
    bn2_beta = 0.1 * jax.random.normal(ks[2], (hidden_feature,))
    bn2_mean = 0.1 * jax.random.normal(ks[3], (hidden_feature,))
    bn2_var = jnp.abs(1.0 + 0.1 * jax.random.normal(ks[4], (hidden_feature,)))
    # Linear(hidden*S, out): weight (Out, Hid*S), bias (Out,)
    lin_w = jax.random.normal(ks[5], (out_features, hidden_feature * S)) * 0.05
    lin_b = 0.01 * jax.random.normal(ks[6], (out_features,))
    # BatchNorm1d(out_features)
    bn1_gamma = 1.0 + 0.1 * jax.random.normal(ks[7], (out_features,))
    bn1_beta = 0.1 * jax.random.normal(ks[8], (out_features,))
    bn1_mean = 0.1 * jax.random.normal(ks[9], (out_features,))
    bn1_var = jnp.ones((out_features,))
    eps = 1e-5

    # Fold batchnorms to per-channel scale/shift (inference).
    bn2_scale = bn2_gamma / jnp.sqrt(bn2_var + eps)
    bn2_shift = bn2_beta - bn2_mean * bn2_scale
    bn1_scale = bn1_gamma / jnp.sqrt(bn1_var + eps)
    bn1_shift = bn1_beta - bn1_mean * bn1_scale

    # --- BN2 scale folded into the 1x1 conv weight: (Cin, Hid).
    convw_folded = (conv_w * bn2_scale[:, None]).T                       # (Cin, Hid)
    # Merged conv weight over the S spatial positions with BOTH input and output
    # feature order = channel-major (c*S + s / d*S + s), i.e. torch's contiguous
    # flatten order, so the runtime input is just x.reshape(B, Cin*S).
    # TODO(synk): O(S^2) FLOPs/VMEM; restructure for large pooling_size.
    wbd = jnp.kron(convw_folded, jnp.eye(S, dtype=jnp.float32))          # (Cin*S, Hid*S)
    # BN2 shift at hidden feature index d*S + s.
    shift = jnp.repeat(bn2_shift, S)                                     # (Hid*S,)

    # --- Linear: torch flatten feature f = d*S + s already matches the hidden
    #     order above, so wlin is simply lin_w.T with BN1 scale folded in.
    wlin = lin_w.T * bn1_scale[None, :]                                  # (Hid*S, Out)
    bias = lin_b * bn1_scale + bn1_shift                                 # (Out,)

    # --- Lane-pad to multiples of 128 (unmasked vector stores in the kernel);
    #     weights stored bf16, additive terms kept f32.
    NH = S * hidden_feature
    NHP = _round_up(NH, 128)
    OP = _round_up(out_features, 128)
    wbd = jnp.pad(wbd, ((0, 0), (0, NHP - NH))).astype(jnp.bfloat16)
    shift = jnp.pad(shift, (0, NHP - NH)).reshape(1, NHP).astype(jnp.float32)
    wlin = jnp.pad(wlin, ((0, NHP - NH), (0, OP - out_features))).astype(jnp.bfloat16)
    bias = jnp.pad(bias, (0, OP - out_features)).reshape(1, OP).astype(jnp.float32)

    params = {
        "wbd": wbd,
        "shift": shift,
        "wlin": wlin,
        "bias": bias,
        "out_features": out_features,
        # raw torch-layout params (f32) for the reference check
        "_conv_w_torch": conv_w,
        "_bn2_scale": bn2_scale, "_bn2_shift": bn2_shift,
        "_lin_w_torch": lin_w, "_lin_b_torch": lin_b,
        "_bn1_scale": bn1_scale, "_bn1_shift": bn1_shift,
    }
    return params


def reference_forward(x_nchw, params):
    """Pure-JAX f32 reference mirroring the PyTorch forward exactly (NCHW)."""
    B = x_nchw.shape[0]
    conv_w = params["_conv_w_torch"]                             # (Hid, Cin)
    h = jnp.einsum("bchw,dc->bdhw", x_nchw, conv_w)              # Conv2d 1x1, no bias
    s2 = params["_bn2_scale"].reshape(1, -1, 1, 1)
    b2 = params["_bn2_shift"].reshape(1, -1, 1, 1)
    h = h * s2 + b2                                              # BatchNorm2d (eval)
    h = jnp.where(h >= 0.0, h, 0.1 * h)                          # LeakyReLU(0.1); Dropout eval = id
    f = h.reshape(B, -1)                                         # .view(B, -1), channel-major
    y = f @ params["_lin_w_torch"].T + params["_lin_b_torch"]    # Linear
    y = y * params["_bn1_scale"] + params["_bn1_shift"]          # BatchNorm1d (eval)
    return y


if __name__ == "__main__":
    # Small shapes consistent with the module: pooling_size=2 => input spatial 2x2.
    # B=32 so the batch splits into 2 parallel grid steps (both v7x TensorCores).
    B, Cin, Hid, Out, P = 32, 8, 16, 32, 2
    key = jax.random.PRNGKey(0)
    kx, kp = jax.random.split(key)
    x = jax.random.normal(kx, (B, Cin, P, P), dtype=jnp.float32)   # NCHW

    params = make_params(kp, Cin, Hid, Out, P)

    out = reduction_head_forward(x, params)
    out = jax.block_until_ready(out)

    ref = reference_forward(x, params)
    # bf16 weights/activations (f32 accumulation) -> loosened tolerance.
    np.testing.assert_allclose(np.asarray(out), np.asarray(ref), rtol=2e-2, atol=2e-2)

    print("KERNEL_OK")
</pallas_src>

<mosaic_0001>
module attributes {stable_mosaic.version = 11 : i64} {
  func.func @reduction_head_kernel(%arg0: i32, %arg1: memref<16x32xbf16, #tpu.memory_space<vmem>>, %arg2: memref<32x128xbf16, #tpu.memory_space<vmem>>, %arg3: memref<1x128xf32, #tpu.memory_space<vmem>>, %arg4: memref<128x128xbf16, #tpu.memory_space<vmem>>, %arg5: memref<1x128xf32, #tpu.memory_space<vmem>>, %arg6: memref<16x128xf32, #tpu.memory_space<vmem>>) attributes {dimension_semantics = [#tpu.dimension_semantics<parallel>], iteration_bounds = array<i64: 2>, scalar_prefetch = 0 : i64, scratch_operands = 0 : i64, tpu.core_type = #tpu.core_type<tc>, window_params = [{transform_indices = @transform_0, window_bounds = array<i64: 16, 32>}, {pipeline_mode = #tpu.pipeline_mode<synchronous>, transform_indices = @transform_1, window_bounds = array<i64: 32, 128>}, {pipeline_mode = #tpu.pipeline_mode<synchronous>, transform_indices = @transform_2, window_bounds = array<i64: 1, 128>}, {pipeline_mode = #tpu.pipeline_mode<synchronous>, transform_indices = @transform_3, window_bounds = array<i64: 128, 128>}, {pipeline_mode = #tpu.pipeline_mode<synchronous>, transform_indices = @transform_4, window_bounds = array<i64: 1, 128>}, {transform_indices = @transform_5, window_bounds = array<i64: 16, 128>}]} {
    %c0 = arith.constant 0 : index
    %c0_0 = arith.constant 0 : index
    %0 = vector.load %arg1[%c0, %c0_0] : memref<16x32xbf16, #tpu.memory_space<vmem>>, vector<16x32xbf16>
    %c0_1 = arith.constant 0 : index
    %c0_2 = arith.constant 0 : index
    %1 = vector.load %arg2[%c0_1, %c0_2] : memref<32x128xbf16, #tpu.memory_space<vmem>>, vector<32x128xbf16>
    %cst = arith.constant dense<0.000000e+00> : vector<16x128xf32>
    %2 = tpu.matmul %0, %1, %cst {dimension_numbers = #tpu.dot_dimension_numbers<[1], [0], [0], [1], [0, 0, 1, 1], [], []>} : vector<16x32xbf16>, vector<32x128xbf16>, vector<16x128xf32> -> vector<16x128xf32>
    %c0_3 = arith.constant 0 : index
    %c0_4 = arith.constant 0 : index
    %3 = vector.load %arg3[%c0_3, %c0_4] : memref<1x128xf32, #tpu.memory_space<vmem>>, vector<1x128xf32>
    %4 = vector.broadcast %3 : vector<1x128xf32> to vector<16x128xf32>
    %5 = arith.addf %2, %4 : vector<16x128xf32>
    %cst_5 = arith.constant 0.000000e+00 : f32
    %6 = vector.broadcast %cst_5 : f32 to vector<16x128xf32>
    %7 = arith.cmpf oge, %5, %6 : vector<16x128xf32>
    %cst_6 = arith.constant 1.000000e-01 : f32
    %8 = vector.broadcast %cst_6 : f32 to vector<16x128xf32>
    %9 = arith.mulf %8, %5 : vector<16x128xf32>
    %10 = arith.select %7, %5, %9 : vector<16x128xi1>, vector<16x128xf32>
    %11 = arith.truncf %10 : vector<16x128xf32> to vector<16x128xbf16>
    %c0_7 = arith.constant 0 : index
    %c0_8 = arith.constant 0 : index
    %12 = vector.load %arg4[%c0_7, %c0_8] : memref<128x128xbf16, #tpu.memory_space<vmem>>, vector<128x128xbf16>
    %cst_9 = arith.constant dense<0.000000e+00> : vector<16x128xf32>
    %13 = tpu.matmul %11, %12, %cst_9 {dimension_numbers = #tpu.dot_dimension_numbers<[1], [0], [0], [1], [0, 0, 1, 1], [], []>} : vector<16x128xbf16>, vector<128x128xbf16>, vector<16x128xf32> -> vector<16x128xf32>
    %c0_10 = arith.constant 0 : index
    %c0_11 = arith.constant 0 : index
    %14 = vector.load %arg5[%c0_10, %c0_11] : memref<1x128xf32, #tpu.memory_space<vmem>>, vector<1x128xf32>
    %15 = vector.broadcast %14 : vector<1x128xf32> to vector<16x128xf32>
    %16 = arith.addf %13, %15 : vector<16x128xf32>
    %c0_12 = arith.constant 0 : index
    %c0_13 = arith.constant 0 : index
    %17 = vector.load %arg6[%c0_12, %c0_13] : memref<16x128xf32, #tpu.memory_space<vmem>>, vector<16x128xf32>
    tpu.vector_store %arg6[%c0_12, %c0_13], %16 {strides = array<i32>} : memref<16x128xf32, #tpu.memory_space<vmem>>, vector<16x128xf32>,
    return
  }
  func.func @transform_0(%arg0: i32) -> (i32, i32) {
    %c0_i32 = arith.constant 0 : i32
    %c0_i32_0 = arith.constant 0 : i32
    return %arg0, %c0_i32 : i32, i32
  }
  func.func @transform_1(%arg0: i32) -> (i32, i32) {
    %c0_i32 = arith.constant 0 : i32
    %c0_i32_0 = arith.constant 0 : i32
    %c0_i32_1 = arith.constant 0 : i32
    return %c0_i32, %c0_i32_0 : i32, i32
  }
  func.func @transform_2(%arg0: i32) -> (i32, i32) {
    %c0_i32 = arith.constant 0 : i32
    %c0_i32_0 = arith.constant 0 : i32
    %c0_i32_1 = arith.constant 0 : i32
    return %c0_i32, %c0_i32_0 : i32, i32
  }
  func.func @transform_3(%arg0: i32) -> (i32, i32) {
    %c0_i32 = arith.constant 0 : i32
    %c0_i32_0 = arith.constant 0 : i32
    %c0_i32_1 = arith.constant 0 : i32
    return %c0_i32, %c0_i32_0 : i32, i32
  }
  func.func @transform_4(%arg0: i32) -> (i32, i32) {
    %c0_i32 = arith.constant 0 : i32
    %c0_i32_0 = arith.constant 0 : i32
    %c0_i32_1 = arith.constant 0 : i32
    return %c0_i32, %c0_i32_0 : i32, i32
  }
  func.func @transform_5(%arg0: i32) -> (i32, i32) {
    %c0_i32 = arith.constant 0 : i32
    %c0_i32_0 = arith.constant 0 : i32
    return %arg0, %c0_i32 : i32, i32
  }
}

</mosaic_0001>

<bundles_post_ra>
// kernel: tpu_custom_call.1
= control target key start
LH: loop header
LB: loop body
LE: loop exit
PB: predicated region body
PF: predicated region fallthrough
CT: control target
= control target key end

     0   :  { %10 = vsyncpa [#allocation3], 0  ;;  %s1129_s0 = inlined_call_operand.hbm [shape: bf16[32,32], index: 0, kind: input, shape index: {}]   ;;  %s1130_s1 = inlined_call_operand.hbm [shape: bf16[32,128], index: 1, kind: input, shape index: {}]   ;;  %s1131_s2 = inlined_call_operand.vmem [shape: f32[1,128], index: 2, kind: input, shape index: {}]   ;;  %s1132_s3 = inlined_call_operand.hbm [shape: bf16[128,128], index: 3, kind: input, shape index: {}]   ;;  %s1133_s4 = inlined_call_operand.vmem [shape: f32[1,128], index: 4, kind: input, shape index: {}]   ;;  %s1134_s5 = inlined_call_operand.hbm [shape: f32[32,128], index: 5, kind: output, shape index: {}]  }
   0x1   :  { %12 = vsyncpa [#allocation3 + $0x1], 0 }
   0x2   :  { %13 = vsyncpa [#allocation6], 0 }
   0x3   :  { %14 = vsyncpa [#allocation4], 0 }
   0x4   :  { %16 = vsyncpa [#allocation4 + $0x1], 0  ;;  %s925_s18 = smov 0   ;;  %s927_s19 = smov 0  }
   0x5   :  { %s929_s20 = smov 0   ;;  %s931_s21 = smov 0  }
   0x6 LB: > { %s946_s22 = sadd.s32 4294967295, %s883_s21   ;;  %s577_s23 = sadd.s32 4294967294, %s883_s21   ;;  %s883_s21 = sphi %s931_s21, %s1157_s21   ;;  %s879_s20 = sphi %s929_s20, %s1156_s20   ;;  %s875_s19 = sphi %s927_s19, %s1155_s19   ;;  %s871_s18 = sphi %s925_s18, %s1154_s18  }
   0x7   : > { %p42_p0 = scmp.ne.s32.totalorder %s875_s19, %s871_s18  ;;  %p1135_p1 = scmp.eq.s32.totalorder %s946_s22, 0 }
   0x8   : > { %p150_p2 = scmp.eq.s32.totalorder %s946_s22, 1  ;;  %p156_p3 = scmp.eq.s32.totalorder %s577_s23, 1 }
   0x9   : > { %p955_p4 = por %p1135_p1, %p42_p0  ;;  %p578_p5 = scmp.ge.s32.totalorder %s883_s21, 1 }
   0xa   : > { %p960_p6 = por %p156_p3, %p42_p0  ;;  %p163_p7 = scmp.lt.s32.totalorder %s883_s21, 3 }
   0xb   : > { %s1140_s24 = scalar_select %p955_p4, 1, 0 }
   0xc   : > { %s1141_s25 = scalar_select %p960_p6, 1, 0 }
   0xd   : > { %p965_p8 = pnand %p578_p5, %p163_p7  ;;  %s885_s27 = smov [#allocation5]  }
   0xe   : > { %s175_s28 = sshll.u32 %s885_s27, 4  ;;  %s886_s30 = smov [#allocation7]   ;;  %s176_s28 = int_to_ptr.vmem [resolvable:$true] %s175_s28 }
   0xf   : > { %s1142_s26 = scalar_select %p965_p8, 1, 0 }
  0x10   : > { %p663_p9 = pneg %p965_p8  ;;  %s191_s6 = sshll.u32 %s886_s30, 4  ;;  %s192_s6 = int_to_ptr.vmem [resolvable:$true] %s191_s6 }
  0x11   : > { %s746_s7 = scalar_lea.vmem %s176_s28, 256  ;;  %p754_p5 = scmp.lt.s32.totalorder %s176_s28, %s176_s28 }
  0x12   : > { %p974_p11 = pnand %p663_p9, %p1135_p1  ;;  %p747_p13 = scmp.ne.s32.totalorder %s176_s28, %s746_s7 }
  0x13   : > { %p755_p7 = scmp.lt.s32.totalorder %s746_s7, %s746_s7 }
  0x14   : > { %p737_p12 = pneg %p974_p11 }
  0x15   : > { %p756_p10 = por %p755_p7, %p754_p5 }
  0x16   : > { %p749_p0 = pnand %p747_p13, %p737_p12 }
  0x18   : > { %p750_p3 = pneg %p749_p0 }
  0x1a   : > { %p757_p9 = pnand %p756_p10, %p750_p3 }
  0x1c   : > { %760 = shalt.err (!%p757_p9)
}
  0x1d   : > { %s1136_s8 = smov 64   ;;  %s888_s9 = smov 4  }
  0x1e   : > { %666 = dma.hbm_to_vmem [thread:$0]  (!%p974_p11), %s1130_s1, 256, %s176_s28, [#allocation6], %s1136_s8, %s1136_s8, %s888_s9  }
  0x1f   : > { %s772_s12 = scalar_lea.vmem %s192_s6, 1024  ;;  %p780_p10 = scmp.lt.s32.totalorder %s192_s6, %s192_s6 }
  0x20   : > { %p773_p13 = scmp.ne.s32.totalorder %s192_s6, %s772_s12  ;;  %p781_p3 = scmp.lt.s32.totalorder %s772_s12, %s772_s12 }
  0x22   : > { %p775_p0 = pnand %p773_p13, %p737_p12  ;;  %p782_p7 = por %p781_p3, %p780_p10 }
  0x24   : > { %p776_p5 = pneg %p775_p0 }
  0x26   : > { %p783_p9 = pnand %p782_p7, %p776_p5 }
  0x28   : > { %786 = shalt.err (!%p783_p9)
}
  0x29   : > { %669 = dma.hbm_to_vmem [thread:$0]  (!%p974_p11), %s1132_s3, 1024, %s192_s6, [#allocation6], %s1136_s8, %s1136_s8, %s888_s9  }
  0x2a   : > { %s1003_s15 = sadd.s32 1, %s883_s21   ;;  %s29_s16 = sadd.s32 1, %s879_s20 }
  0x2b   : > { %s26_s17 = ssub.s32 %s883_s21, %s1003_s15  ;;  %p36_p12 = scmp.ne.s32.totalorder %s879_s20, %s875_s19 }
  0x2c   : > { %p27_p13 = scmp.eq.s32.totalorder %s26_s17, 0  ;;  %p37_p0 = scmp.eq.s32.totalorder %s883_s21, 0 }
  0x2d   : > { %p1013_p5 = por %p150_p2, %p36_p12  ;;  %p680_p10 = scmp.lt.s32.totalorder %s883_s21, 2 }
  0x2e   : > { %s1019_s27 = scalar_select %p27_p13, %s879_s20, %s29_s16  }
  0x2f   : > { %s1144_s23 = scalar_select %p1013_p5, 1, 0 }
  0x30   : > { %p38_p3 = por %p37_p0, %p36_p12  ;;  %s208_s28 = sand.u32 1, %s879_s20  }
  0x31   : > { %s582_s29 = sshll.u32 %s208_s28, 3  ;;  %s609_s30 = sshll.u32 %s883_s21, 7 }
  0x32   : > { %s1026_s10 = scalar_lea.hbm %s1129_s0, %s609_s30  ;;  %s212_s11 = scalar_lea.vmem [#allocation2], %s582_s29 }
  0x33   : > { %s219_s12 = sshll.u32 %s212_s11, 4  ;;  %p1030_p2 = pnand %p680_p10, %p38_p3  ;;  %s1028_s12 = int_to_ptr.vmem [resolvable:$true] %s219_s12 }
  0x34   : > { %s1034_s14 = scalar_lea.sflag [#allocation3], %s208_s28  ;;  %s787_s16 = scalar_lea.hbm %s1026_s10, 128 }
  0x35   : > { %p788_p11 = scmp.ne.s32.totalorder %s1026_s10, %s787_s16  ;;  %p789_p7 = pneg %p1030_p2 }
  0x36   : > { %s792_s29 = scalar_lea.hbm %s1129_s0, 256  ;;  %p793_p13 = scmp.lt.s32.totalorder %s1026_s10, %s1129_s0 }
  0x37   : > { %p790_p9 = pnand %p789_p7, %p788_p11  ;;  %p794_p0 = scmp.lt.s32.totalorder %s792_s29, %s787_s16 }
  0x39   : > { %p791_p12 = pneg %p790_p9  ;;  %p795_p10 = por %p794_p0, %p793_p13 }
  0x3b   : > { %p796_p3 = pnand %p795_p10, %p791_p12 }
  0x3d   : > { %799 = shalt.err (!%p796_p3)
}
  0x3e   : > { %s800_s28 = scalar_lea.vmem %s1028_s12, 128  ;;  %s889_s11 = smov [#allocation2]  }
  0x3f   : > { %p801_p1 = scmp.ne.s32.totalorder %s1028_s12, %s800_s28  ;;  %s805_s8 = sshll.u32 %s889_s11, 4  ;;  %s806_s8 = int_to_ptr.vmem [resolvable:$false] %s805_s8 }
  0x40   : > { %s807_s17 = scalar_lea.vmem %s806_s8, 256  ;;  %p808_p9 = scmp.lt.s32.totalorder %s1028_s12, %s806_s8 }
  0x41   : > { %p803_p6 = pnand %p801_p1, %p789_p7  ;;  %p809_p5 = scmp.lt.s32.totalorder %s807_s17, %s800_s28 }
  0x43   : > { %p804_p11 = pneg %p803_p6  ;;  %p810_p4 = por %p809_p5, %p808_p9 }
  0x45   : > { %p811_p8 = pnand %p810_p4, %p804_p11 }
  0x47   : > { %814 = shalt.err (!%p811_p8)
}
  0x48   : > { %s1146_s16 = smov 64   ;;  %p1147_p1 = scmp.ne.s32.totalorder %s1142_s26, 0 }
  0x49   : > { %673 = dma.hbm_to_vmem [thread:$0]  (!%p1030_p2), %s1026_s10, 128, %s1028_s12, %s1034_s14, %s1146_s16, %s1146_s16, %s888_s9  }
  0x4a   : > { %231 = sbr.rel (%p1147_p1) target bundleno = 510 (0x1fe), region = 40  ;;  %s1061_s30 = sand.u32 (!%p1147_p1), 1, %s875_s19  }
  0x4b   : > { %s586_s8 = sshll.u32 (!%p1147_p1), %s1061_s30, 3  ;;  %s234_s29 = scalar_lea.sflag (!%p1147_p1), [#allocation3], %s1061_s30 }
  0x4c   : > { %s237_s6 = scalar_lea.vmem (!%p1147_p1), [#allocation2], %s586_s8  ;;  %p1148_p4 = scmp.ne.s32.totalorder (!%p1147_p1), %s1140_s24, 0 }
  0x4f   : > { %858 = dma.done.wait (%p1148_p4), %s234_s29, 128  }
  0x50   : > { %860 = vsyncadd (%p1148_p4), %s234_s29, 4294967168  ;;  %p1149_p6 = scmp.eq.s32.totalorder %s946_s22, 0 }
  0x52   : > { %862 = dma.done.wait (%p1149_p6), [#allocation6], 1280   ;;  %p1150_p8 = pmov %p1149_p6 }
  0x53   : > { %v890_v0 = vmov 0.0   ;;  %vm891_vm0 = vmmov 0   ;;  %v724_v1 = vld [vmem:[#allocation5 + $0x8] sm:$0xff]   ;;  %v725_v2 = vld [vmem:[#allocation5] sm:$0xff]   ;;  %v726_v4 = vld [vmem:[%s237_s6] sm:$0xff]   ;;  %vm305_vm1 = vcmask 261120  }
  0x54   : > { %864 = vsyncadd (%p1150_p8), [#allocation6], 4294966016  ;;  %623 = vmatprep.subr.bf16.mxu0 %v890_v0  ;;  %627 = vmatprep.mubr.msk.bf16.mxu0 %vm891_vm0, %v890_v0  ;;  %v727_v3 = vld [vmem:[#allocation7 + $0x38] sm:$0xff]   ;;  %v728_v5 = vld [vmem:[#allocation7 + $0x30] sm:$0xff]   ;;  %s589_s9 = sshll.u32 %s1061_s30, 4  ;;  %s610_s7 = sshll.u32 %s946_s22, 8 }
  0x55   : > { %631 = vmatprep.subr.bf16.mxu1 %v890_v0  ;;  %647 = vmatprep.mubr.msk.bf16.mxu1 %vm891_vm0, %v890_v0  ;;  %v729_v6 = vld [vmem:[#allocation7 + $0x28] sm:$0xff]   ;;  %v730_v7 = vld [vmem:[#allocation7 + $0x20] sm:$0xff]   ;;  %v731_v8 = vld [vmem:[#allocation7 + $0x18] sm:$0xff]   ;;  %s271_s13 = scalar_lea.vmem [#allocation8], %s589_s9  ;;  %s1086_s17 = scalar_lea.hbm %s1134_s5, %s610_s7 }
  0x56   : > { %624 = vmatpush3.bf16.msra.mxu0 %v724_v1  ;;  %632 = vmatpush3.bf16.msra.mxu1 %v727_v3  ;;  %v732_v9 = vld [vmem:[#allocation7 + $0x10] sm:$0xff]   ;;  %v733_v10 = vld [vmem:[#allocation7 + $0x8] sm:$0xff]   ;;  %v734_v11 = vld [vmem:[#allocation7] sm:$0xff]   ;;  %s485_s14 = sshll.u32 %s271_s13, 4  ;;  %s472_s16 = scalar_lea.sflag [#allocation4], %s1061_s30  ;;  %s1081_s14 = int_to_ptr.vmem [resolvable:$true] %s485_s14 }
  0x57   : > { %625 = vmatprep.subr.bf16.mxu0 %v890_v0  ;;  %633 = vmatprep.subr.bf16.mxu1 %v890_v0  ;;  %v590_v12 = vld [vmem:[%s1131_s2] ss:$0 sm:$0xff]  ;;  %s815_s8 = scalar_lea.vmem %s1081_s14, 256  ;;  %p1151_p2 = scmp.ne.s32.totalorder %s1144_s23, 0 }
  0x58   : > { %v595_v24 = vld [vmem:[%s1133_s4] ss:$0 sm:$0xff]  ;;  %p816_p5 = scmp.ne.s32.totalorder %s1081_s14, %s815_s8  ;;  %s892_s22 = smov [#allocation8]  }
  0x59   : > { %s819_s29 = sshll.u32 %s892_s22, 4  ;;  %s820_s29 = int_to_ptr.vmem [resolvable:$false] %s819_s29 }
  0x5a   : > { %626 = vmatpush3.bf16.msra.mxu0 %v725_v2  ;;  %634 = vmatpush3.bf16.msra.mxu1 %v728_v5  ;;  %p817_p7 = pnand %p816_p5, %p1151_p2  ;;  %s821_s6 = scalar_lea.vmem %s820_s29, 512 }
  0x5b   : > { %635 = vmatprep.subr.bf16.mxu1 %v890_v0  ;;  %p822_p13 = scmp.lt.s32.totalorder %s1081_s14, %s820_s29  ;;  %p823_p0 = scmp.lt.s32.totalorder %s821_s6, %s815_s8 }
  0x5c   : > { %p818_p12 = pneg %p817_p7 }
  0x5d   : > { %628 = vmatmul.mubr.msk.bf16.vlgmr.msra.gmra.mxu0 %vm305_vm1, %v726_v4  ;;  %p824_p10 = por %p823_p0, %p822_p13 }
  0x5e   : > { %636 = vmatpush3.bf16.msra.mxu1 %v729_v6 }
  0x5f   : > { %637 = vmatprep.subr.bf16.mxu1 %v890_v0  ;;  %p825_p3 = pnand %p824_p10, %p818_p12 }
  0x62   : > { %638 = vmatpush3.bf16.msra.mxu1 %v730_v7 }
  0x63   : > { %639 = vmatprep.subr.bf16.mxu1 %v890_v0 }
  0x66   : > { %640 = vmatpush3.bf16.msra.mxu1 %v731_v8 }
  0x67   : > { %641 = vmatprep.subr.bf16.mxu1 %v890_v0 }
  0x6a   : > { %642 = vmatpush3.bf16.msra.mxu1 %v732_v9 }
  0x6b   : > { %643 = vmatprep.subr.bf16.mxu1 %v890_v0 }
  0x6e   : > { %644 = vmatpush3.bf16.msra.mxu1 %v733_v10 }
  0x6f   : > { %645 = vmatprep.subr.bf16.mxu1 %v890_v0 }
  0x72   : > { %646 = vmatpush3.bf16.msra.mxu1 %v734_v11 }
 0x11d   : > { %v343_v13 = vpop.f32.mrf.mxu0 }
 0x11e   : > { %v344_v14 = vadd.f32 %v590_v12, %v343_v13 }
 0x11f   : > { %v629_v15 = vpop.f32.mrf.mxu0 }
 0x120   : > { %v352_v17 = vmul.f32 0.1, %v344_v14  ;;  %vm350_vm2 = vcmp.ge.f32.partialorder %v344_v14, 0.0 }
 0x121   : > { %v346_v16 = vpop.f32.mrf.mxu0 }
 0x122   : > { %v347_v18 = vadd.f32 %v590_v12, %v346_v16  ;;  %v354_v21 = vsel %vm350_vm2, %v344_v14, %v352_v17 }
 0x123   : > { %v630_v19 = vpop.f32.mrf.mxu0 }
 0x124   : > { %vm351_vm3 = vcmp.ge.f32.partialorder %v347_v18, 0.0  ;;  %v353_v20 = vmul.f32 0.1, %v347_v18 }
 0x126   : > { %v355_v22 = vsel %vm351_vm3, %v347_v18, %v353_v20 }
 0x127   : > { %v356_v23 = vpack.c.bf16 %v355_v22, %v354_v21 }
 0x129   : > { %648 = vmatmul.mubr.bf16.vlgmr.msra.gmra.mxu1 %v356_v23 }
 0x1e9   : > { %v462_v25 = vpop.f32.mrf.mxu1 }
 0x1ea   : > { %v463_v26 = vadd.f32 %v595_v24, %v462_v25 }
 0x1eb   : > { %v649_v27 = vpop.f32.mrf.mxu1 }
 0x1ec   : > { %469 = vst [vmem:[%s271_s13] sm:$0xff] %v463_v26 }
 0x1ed   : > { %v465_v28 = vpop.f32.mrf.mxu1 }
 0x1ee   : > { %v466_v29 = vadd.f32 %v595_v24, %v465_v28 }
 0x1ef   : > { %v650_v30 = vpop.f32.mrf.mxu1 }
 0x1f0   : > { %470 = vst [vmem:[%s271_s13 + $0x8] sm:$0xff] %v466_v29 }
 0x1f1   : > { %828 = shalt.err (!%p825_p3)
}
 0x1f2   : > { %s829_s24 = scalar_lea.hbm %s1086_s17, 256  ;;  %s833_s10 = scalar_lea.hbm %s1134_s5, 512 }
 0x1f3   : > { %p830_p11 = scmp.ne.s32.totalorder %s1086_s17, %s829_s24  ;;  %p834_p4 = scmp.lt.s32.totalorder %s1086_s17, %s1134_s5 }
 0x1f4   : > { %p835_p6 = scmp.lt.s32.totalorder %s833_s10, %s829_s24 }
 0x1f5   : > { %p831_p9 = pnand %p830_p11, %p1151_p2 }
 0x1f6   : > { %p836_p8 = por %p835_p6, %p834_p4 }
 0x1f7   : > { %p832_p1 = pneg %p831_p9 }
 0x1f9   : > { %p837_p5 = pnand %p836_p8, %p832_p1 }
 0x1fb   : > { %840 = shalt.err (!%p837_p5)
}
 0x1fc   : > { %s893_s7 = smov 128   ;;  %s894_s28 = smov 8  }
 0x1fd   : > { %661 = dma.vmem_to_hbm [thread:$0]  (%p1151_p2), %s1081_s14, 256, %s1086_s17, %s472_s16, %s893_s7, %s893_s7, %s894_s28  }
 0x1fe PF: > { %s500_s11 = sand.u32 1, %s871_s18   ;;  %p1152_p7 = scmp.ne.s32.totalorder %s1141_s25, 0 }
 0x1ff   : > { %p1153_p12 = scmp.ge.s32.totalorder %s883_s21, 2  ;;  %s501_s8 = scalar_lea.sflag [#allocation4], %s500_s11 }
 0x201   : > { %p675_p13 = pnand %p1153_p12, %p1152_p7 }
 0x203   : > { %p676_p0 = pneg %p675_p13 }
 0x205   : > { %866 = dma.done.wait (%p676_p0), %s501_s8, 256  }
 0x206   : > { %868 = vsyncadd (%p676_p0), %s501_s8, 4294967040  ;;  %p19_p10 = scmp.ge.s32.totalorder %s1003_s15, 4   ;;  %s1154_s18 = smov %s875_s19 }
 0x207   : > { %s1155_s19 = smov %s879_s20  ;;  %s1156_s20 = smov %s1019_s27 }
 0x208   : > { %s1157_s21 = smov %s1003_s15  ;;  %21 = sbr.rel (!%p19_p10) target bundleno = 6 (0x6), region = 93 }
 0x20d   :  { %506 = vsyncpa [#allocation3], 1 }
 0x20e   :  { %508 = vsyncpa [#allocation3 + $0x1], 1 }
 0x20f   :  { %509 = vsyncpa [#allocation6], 1 }
 0x210   :  { %510 = vsyncpa [#allocation4], 1 }
 0x211   :  { %512 = vsyncpa [#allocation4 + $0x1], 1 }

</bundles_post_ra>
